<compile_context>
chip_gen: v5e
topology: v5e:2x2
jax: 0.10.0
libtpu: 0.0.40
codegen_flags: <defaults>
</compile_context>

<pallas_src>
import jax
import jax.numpy as jnp
from jax.experimental import pallas as pl
from jax.experimental.pallas import tpu as pltpu

J_H36M = 17     # rows of the h36m regressor == output joints
J_HALPE = 26    # rows of the halpe regressor

HALPE2H36M = [19, 12, 14, 16, 11, 13, 15, 19, 19, 18, 17, 5, 7, 9, 6, 8, 10]
H36M_OVERRIDE = [7, 8, 9, 10]


def _round_up(x, m):
    return (x + m - 1) // m * m


def _mpjpe_kernel(wexp_ref, x_ref, g_ref, o_ref):
    """One grid step == TB samples.

    wexp_ref: (3V, 3J)   block-diagonal fused regressor (resident, bf16).
    x_ref   : (TB, 3V)   vertices in native memory order ([x0,y0,z0,x1,...]), bf16.
    g_ref   : (4, TB, J) gt joints, coordinate-major rows (x, y, z, conf), f32.
    o_ref   : (1, 1, J)  per-joint partial sums of conf-weighted distances.
    """
    J = o_ref.shape[-1]

    # One MXU dot replaces the previous three per-coordinate dots:
    #   pred[:, c*J + j] == coordinate c of predicted joint j.
    pred = jnp.dot(x_ref[...], wexp_ref[...],
                   preferred_element_type=jnp.float32)            # (TB, 3J) f32

    # Per-coordinate (pred - gt), then pelvis (joint 0) alignment of the
    # *difference* (alignment is linear, so this equals aligning pred and gt
    # separately, with one fewer subtract per coordinate).
    dx = pred[:, 0 * J:1 * J] - g_ref[0]
    dy = pred[:, 1 * J:2 * J] - g_ref[1]
    dz = pred[:, 2 * J:3 * J] - g_ref[2]
    dx = dx - dx[:, 0:1]
    dy = dy - dy[:, 0:1]
    dz = dz - dz[:, 0:1]

    # NOTE: sqrt(0) at zero-confidence / zero-padded rows is fine in the forward
    # pass; add an eps or mask if a VJP is ever attached.
    diff = jnp.sqrt((dx * dx + dy * dy + dz * dz) * g_ref[3])     # (TB, J)

    # Per-joint sums over this tile's samples (sublane reduce -> lane-major
    # (1, J) row, one small store).  The wrapper finishes the exact
    # mean-over-joints / mean-over-batch / *1000.
    o_ref[...] = jnp.sum(diff, axis=0, keepdims=True)[None]


def build_combined_regressor(h36m_reg, halpe_reg):
    """Fuse the two regressions + halpe2h36m gather + row override into one
    (17, V) regressor, then expand it block-diagonally to (3V, 3*17) so the
    kernel can consume vertices in their native (B, V, 3) layout flattened to
    (B, 3V) without transposing the vertex tensor:

        verts_flat[b, 3*v + c]       = verts[b, v, c]
        Wexp[3*v + c, d*17 + j]      = (c == d) * W[j, v]
        (verts_flat @ Wexp)[b, d*17 + j] = pred_joint[b, j, d]
    """
    idx = jnp.asarray(HALPE2H36M, dtype=jnp.int32)
    W = halpe_reg[idx]                                   # (17, V)
    ov = jnp.asarray(H36M_OVERRIDE, dtype=jnp.int32)
    W = W.at[ov].set(h36m_reg[ov])                       # (17, V)
    J, V = W.shape
    WT = W.T                                             # (V, J)
    eye3 = jnp.eye(3, dtype=WT.dtype)
    # (V, 3, 3, J) -> (3V, 3J): row index 3v+c, col index d*J+j.
    Wexp = (eye3[None, :, :, None] * WT[:, None, None, :]).reshape(3 * V, 3 * J)
    return Wexp


def mpjpe_h36m_pallas(Wexp, verts, gt, *, tb=64, vmem_limit_bytes=None,
                      compute_dtype=jnp.bfloat16):
    """Wexp: (3V, 3*17) from build_combined_regressor, verts: (B, V, 3),
    gt: (B, 17, 4) = [x, y, z, conf].  Returns the scalar loss (mm).

    tb: samples per grid step.  64 (default) is safe on every generation
        (v7x: 64 MiB VMEM).  On v5e/v6e (128 MiB VMEM) tb=128..256 with
        vmem_limit_bytes ~ 64 MiB is a modest further win.
    compute_dtype: dtype of the vertex/regressor stream fed to the MXU.
        bfloat16 halves the dominant HBM stream (op is bandwidth-bound);
        accumulation stays f32.  Use jnp.float32 (ideally with a HIGHEST-
        precision dot) for bit-closer parity with the PyTorch fp32 matmul.
    """
    B, V, three = verts.shape
    assert three == 3
    V3, J3 = Wexp.shape
    assert V3 == 3 * V
    J = J3 // 3

    # Batch tile: multiple of 8 sublanes (16 for 16-bit streams); capped so the
    # 1-D "parallel" grid has >= 2 tiles whenever the batch allows it.
    q = 16 if jnp.dtype(compute_dtype).itemsize < 4 else 8
    TB = max(q, min(_round_up(tb, q), _round_up(B, q)))
    if _round_up(B, q) >= 2 * q:
        TB = min(TB, _round_up((B + 1) // 2, q))
    Bp = _round_up(B, TB)

    # Dominant stream in compute_dtype (ideally the producer already emits bf16
    # vertices; otherwise this cast fuses with the pad/reshape under jit).
    verts = verts.astype(compute_dtype)
    gt = gt.astype(jnp.float32)
    if Bp != B:
        # Zero-padded samples have zero confidence => contribute exactly 0.
        verts = jnp.pad(verts, ((0, Bp - B), (0, 0), (0, 0)))
        gt = jnp.pad(gt, ((0, Bp - B), (0, 0), (0, 0)))

    # Layout plumbing (cheap): the vertex reshape is a free contiguous
    # (Bp, V, 3) -> (Bp, 3V) merge -- no transpose of the big tensor; gt is tiny
    # (68 floats/sample) and is transposed so xyz+conf arrive as one lane-dense
    # (4, TB, 17) block per step.
    X = verts.reshape(Bp, V3)
    G = jnp.transpose(gt, (2, 0, 1))                     # (4, Bp, J)

    num_tiles = Bp // TB
    compiler_kwargs = dict(dimension_semantics=("parallel",))
    if vmem_limit_bytes is not None:
        compiler_kwargs["vmem_limit_bytes"] = int(vmem_limit_bytes)

    partial_sums = pl.pallas_call(
        _mpjpe_kernel,
        out_shape=jax.ShapeDtypeStruct((num_tiles, 1, J), jnp.float32),
        grid_spec=pltpu.PrefetchScalarGridSpec(
            num_scalar_prefetch=0,
            grid=(num_tiles,),
            in_specs=[
                # Fused regressor: constant index_map -> fetched once, resident.
                # (Single-buffering it via pipeline_mode=pl.Buffered(1) would
                # free a few more MiB of VMEM; not needed at TB <= 128.)
                pl.BlockSpec((V3, J3), lambda i: (0, 0)),
                pl.BlockSpec((TB, V3), lambda i: (i, 0)),       # verts tile
                pl.BlockSpec((4, TB, J), lambda i: (0, i, 0)),   # gt xyz + conf
            ],
            out_specs=pl.BlockSpec((1, 1, J), lambda i: (i, 0, 0)),
        ),
        compiler_params=pltpu.CompilerParams(**compiler_kwargs),
    )(Wexp.astype(compute_dtype), X, G)

    # Exact mean over joints then over the true batch (padded rows are zero).
    return jnp.sum(partial_sums) * (1000.0 / (J * B))


def mpjpe_h36m_reference(h36m_reg, halpe_reg, verts, gt):
    """Pure-JAX (f32) replica of the PyTorch forward(), for verification."""
    conf = gt[:, :, -1]
    h36m_j = jnp.einsum("jv,bvd->bjd", h36m_reg, verts)
    halpe_j = jnp.einsum("jv,bvd->bjd", halpe_reg, verts)
    pred = halpe_j[:, jnp.asarray(HALPE2H36M)]
    pred = pred.at[:, jnp.asarray(H36M_OVERRIDE)].set(
        h36m_j[:, jnp.asarray(H36M_OVERRIDE)])
    gt_xyz = gt[:, :, :3]
    pred = pred - pred[:, 0:1, :]
    gt_xyz = gt_xyz - gt_xyz[:, 0:1, :]
    diff = jnp.sqrt(jnp.sum((pred - gt_xyz) ** 2, axis=2) * conf)
    return jnp.mean(jnp.mean(diff, axis=1)) * 1000.0


if __name__ == "__main__":
    # Small synthetic shapes: B=29 exercises both the zero-padding path
    # (Bp=32 with TB=16) and a 2-tile "parallel" grid; 256 "vertices".
    B, V = 29, 256

    key = jax.random.PRNGKey(0)
    k1, k2, k3, k4, k5 = jax.random.split(key, 5)

    # Deterministic synthetic regressors (the real ones are sparse non-negative
    # row-normalized matrices loaded from .npy; here: abs + row-normalize).
    # TODO(synk): real module loads data/J_regressor_{h36m,halpe}.npy from disk.
    h36m_reg = jnp.abs(jax.random.normal(k1, (J_H36M, V), dtype=jnp.float32))
    h36m_reg = h36m_reg / jnp.sum(h36m_reg, axis=1, keepdims=True)
    halpe_reg = jnp.abs(jax.random.normal(k2, (J_HALPE, V), dtype=jnp.float32))
    halpe_reg = halpe_reg / jnp.sum(halpe_reg, axis=1, keepdims=True)

    # Inputs: predicted mesh vertices and gt joints [xyz, conf].
    verts = jax.random.normal(k3, (B, V, 3), dtype=jnp.float32)
    gt_xyz = jax.random.normal(k4, (B, J_H36M, 3), dtype=jnp.float32)
    gt_conf = jax.random.uniform(k5, (B, J_H36M, 1), dtype=jnp.float32)
    gt = jnp.concatenate([gt_xyz, gt_conf], axis=-1)

    Wexp = build_combined_regressor(h36m_reg, halpe_reg)

    loss = jax.block_until_ready(jax.jit(mpjpe_h36m_pallas)(Wexp, verts, gt))
    ref = jax.block_until_ready(
        mpjpe_h36m_reference(h36m_reg, halpe_reg, verts, gt))
    assert jnp.allclose(loss, ref, rtol=1e-2, atol=1e-2), (loss, ref)

    print("KERNEL_OK")
</pallas_src>

<mosaic_0001>
module attributes {stable_mosaic.version = 11 : i64} {
  func.func @_mpjpe_kernel(%arg0: i32, %arg1: memref<768x51xbf16, #tpu.memory_space<vmem>>, %arg2: memref<16x768xbf16, #tpu.memory_space<vmem>>, %arg3: memref<4x16x17xf32, #tpu.memory_space<vmem>>, %arg4: memref<1x1x17xf32, #tpu.memory_space<vmem>>) attributes {dimension_semantics = [#tpu.dimension_semantics<parallel>], iteration_bounds = array<i64: 2>, scalar_prefetch = 0 : i64, scratch_operands = 0 : i64, tpu.core_type = #tpu.core_type<tc>, window_params = [{pipeline_mode = #tpu.pipeline_mode<synchronous>, transform_indices = @transform_0, window_bounds = array<i64: 768, 51>}, {transform_indices = @transform_1, window_bounds = array<i64: 16, 768>}, {transform_indices = @transform_2, window_bounds = array<i64: 4, 16, 17>}, {transform_indices = @transform_3, window_bounds = array<i64: 1, 1, 17>}]} {
    %c0 = arith.constant 0 : index
    %c0_0 = arith.constant 0 : index
    %0 = vector.load %arg2[%c0, %c0_0] : memref<16x768xbf16, #tpu.memory_space<vmem>>, vector<16x768xbf16>
    %c0_1 = arith.constant 0 : index
    %c0_2 = arith.constant 0 : index
    %1 = vector.load %arg1[%c0_1, %c0_2] : memref<768x51xbf16, #tpu.memory_space<vmem>>, vector<768x51xbf16>
    %cst = arith.constant dense<0.000000e+00> : vector<16x51xf32>
    %2 = tpu.matmul %0, %1, %cst {dimension_numbers = #tpu.dot_dimension_numbers<[1], [0], [0], [1], [0, 0, 1, 1], [], []>} : vector<16x768xbf16>, vector<768x51xbf16>, vector<16x51xf32> -> vector<16x51xf32>
    %3 = vector.extract_strided_slice %2 {offsets = [0, 0], sizes = [16, 17], strides = [1, 1]} : vector<16x51xf32> to vector<16x17xf32>
    %c0_3 = arith.constant 0 : index
    %c0_4 = arith.constant 0 : index
    %c0_5 = arith.constant 0 : index
    %4 = vector.load %arg3[%c0_3, %c0_4, %c0_5] : memref<4x16x17xf32, #tpu.memory_space<vmem>>, vector<1x16x17xf32>
    %5 = vector.shape_cast %4 : vector<1x16x17xf32> to vector<16x17xf32>
    %6 = arith.subf %3, %5 : vector<16x17xf32>
    %7 = vector.extract_strided_slice %2 {offsets = [0, 17], sizes = [16, 17], strides = [1, 1]} : vector<16x51xf32> to vector<16x17xf32>
    %c1 = arith.constant 1 : index
    %c0_6 = arith.constant 0 : index
    %c0_7 = arith.constant 0 : index
    %8 = vector.load %arg3[%c1, %c0_6, %c0_7] : memref<4x16x17xf32, #tpu.memory_space<vmem>>, vector<1x16x17xf32>
    %9 = vector.shape_cast %8 : vector<1x16x17xf32> to vector<16x17xf32>
    %10 = arith.subf %7, %9 : vector<16x17xf32>
    %11 = vector.extract_strided_slice %2 {offsets = [0, 34], sizes = [16, 17], strides = [1, 1]} : vector<16x51xf32> to vector<16x17xf32>
    %c2 = arith.constant 2 : index
    %c0_8 = arith.constant 0 : index
    %c0_9 = arith.constant 0 : index
    %12 = vector.load %arg3[%c2, %c0_8, %c0_9] : memref<4x16x17xf32, #tpu.memory_space<vmem>>, vector<1x16x17xf32>
    %13 = vector.shape_cast %12 : vector<1x16x17xf32> to vector<16x17xf32>
    %14 = arith.subf %11, %13 : vector<16x17xf32>
    %15 = vector.extract_strided_slice %6 {offsets = [0, 0], sizes = [16, 1], strides = [1, 1]} : vector<16x17xf32> to vector<16x1xf32>
    %16 = vector.broadcast %15 : vector<16x1xf32> to vector<16x17xf32>
    %17 = arith.subf %6, %16 : vector<16x17xf32>
    %18 = vector.extract_strided_slice %10 {offsets = [0, 0], sizes = [16, 1], strides = [1, 1]} : vector<16x17xf32> to vector<16x1xf32>
    %19 = vector.broadcast %18 : vector<16x1xf32> to vector<16x17xf32>
    %20 = arith.subf %10, %19 : vector<16x17xf32>
    %21 = vector.extract_strided_slice %14 {offsets = [0, 0], sizes = [16, 1], strides = [1, 1]} : vector<16x17xf32> to vector<16x1xf32>
    %22 = vector.broadcast %21 : vector<16x1xf32> to vector<16x17xf32>
    %23 = arith.subf %14, %22 : vector<16x17xf32>
    %24 = arith.mulf %17, %17 : vector<16x17xf32>
    %25 = arith.mulf %20, %20 : vector<16x17xf32>
    %26 = arith.addf %24, %25 : vector<16x17xf32>
    %27 = arith.mulf %23, %23 : vector<16x17xf32>
    %28 = arith.addf %26, %27 : vector<16x17xf32>
    %c3 = arith.constant 3 : index
    %c0_10 = arith.constant 0 : index
    %c0_11 = arith.constant 0 : index
    %29 = vector.load %arg3[%c3, %c0_10, %c0_11] : memref<4x16x17xf32, #tpu.memory_space<vmem>>, vector<1x16x17xf32>
    %30 = vector.shape_cast %29 : vector<1x16x17xf32> to vector<16x17xf32>
    %31 = arith.mulf %28, %30 : vector<16x17xf32>
    %32 = math.sqrt %31 : vector<16x17xf32>
    %cst_12 = arith.constant dense<0.000000e+00> : vector<17xf32>
    %33 = vector.multi_reduction <add>, %32, %cst_12 [0] : vector<16x17xf32> to vector<17xf32>
    %34 = vector.shape_cast %33 : vector<17xf32> to vector<1x17xf32>
    %35 = vector.shape_cast %34 : vector<1x17xf32> to vector<1x1x17xf32>
    %c0_13 = arith.constant 0 : index
    %c0_14 = arith.constant 0 : index
    %c0_15 = arith.constant 0 : index
    %36 = vector.load %arg4[%c0_13, %c0_14, %c0_15] : memref<1x1x17xf32, #tpu.memory_space<vmem>>, vector<1x1x17xf32>
    tpu.vector_store %arg4[%c0_13, %c0_14, %c0_15], %35 {strides = array<i32>} : memref<1x1x17xf32, #tpu.memory_space<vmem>>, vector<1x1x17xf32>,
    return
  }
  func.func @transform_0(%arg0: i32) -> (i32, i32) {
    %c0_i32 = arith.constant 0 : i32
    %c0_i32_0 = arith.constant 0 : i32
    %c0_i32_1 = arith.constant 0 : i32
    return %c0_i32, %c0_i32_0 : i32, i32
  }
  func.func @transform_1(%arg0: i32) -> (i32, i32) {
    %c0_i32 = arith.constant 0 : i32
    %c0_i32_0 = arith.constant 0 : i32
    return %arg0, %c0_i32 : i32, i32
  }
  func.func @transform_2(%arg0: i32) -> (i32, i32, i32) {
    %c0_i32 = arith.constant 0 : i32
    %c0_i32_0 = arith.constant 0 : i32
    %c0_i32_1 = arith.constant 0 : i32
    return %c0_i32, %arg0, %c0_i32_0 : i32, i32, i32
  }
  func.func @transform_3(%arg0: i32) -> (i32, i32, i32) {
    %c0_i32 = arith.constant 0 : i32
    %c0_i32_0 = arith.constant 0 : i32
    %c0_i32_1 = arith.constant 0 : i32
    return %arg0, %c0_i32, %c0_i32_0 : i32, i32, i32
  }
}

</mosaic_0001>

<bundles_post_ra>
// kernel: mpjpe_h36m_pallas.1
= control target key start
LH: loop header
LB: loop body
LE: loop exit
PB: predicated region body
PF: predicated region fallthrough
CT: control target
= control target key end

     0   :  { %s1341_s12 = smov 0   ;;  %s1343_s13 = smov 0   ;;  %s1567_s0 = inlined_call_operand.vmem [shape: bf16[768,51], index: 0, kind: input, shape index: {}]   ;;  %s1568_s1 = inlined_call_operand.vmem [shape: bf16[32,768], index: 1, kind: input, shape index: {}]   ;;  %s1569_s2 = inlined_call_operand.vmem [shape: f32[4,32,17], index: 2, kind: input, shape index: {}]   ;;  %s1570_s3 = inlined_call_operand.vmem [shape: f32[2,1,17], index: 3, kind: output, shape index: {}]  }
   0x1   :  { %s1345_s14 = smov 0  }
   0x2 LB: > { %s1357_s15 = sadd.s32 4294967295, %s1312_s14   ;;  %s1360_s16 = sadd.s32 1, %s1312_s14   ;;  %s1312_s14 = sphi %s1345_s14, %s1573_s14   ;;  %s1308_s13 = sphi %s1343_s13, %s1572_s13   ;;  %s1304_s12 = sphi %s1341_s12, %s1571_s12  }
   0x3   : > { %s64_s17 = ssub.s32 %s1312_s14, %s1360_s16  ;;  %s67_s18 = sadd.s32 1, %s1308_s13 }
   0x4   : > { %p65_p0 = scmp.eq.s32.totalorder %s64_s17, 0  ;;  %p74_p1 = scmp.ne.s32.totalorder %s1308_s13, %s1304_s12 }
   0x5   : > { %p75_p2 = scmp.eq.s32.totalorder %s1312_s14, 0  ;;  %p962_p4 = scmp.ge.s32.totalorder %s1312_s14, 2 }
   0x6   : > { %s1369_s19 = scalar_select %p65_p0, %s1308_s13, %s67_s18  }
   0x7   : > { %p76_p3 = por %p75_p2, %p74_p1  ;;  %129 = sbr.rel (%p962_p4) target bundleno = 24 (0x18), region = 20 }
   0xc   : > { %142 = sbr.rel (!%p76_p3) target bundleno = 24 (0x18), region = 28  ;;  %s144_s20 = sand.u32 (%p76_p3), 1, %s1308_s13  }
   0xd   : > { %s1194_s21 = sshll.u32 (%p76_p3), %s1312_s14, 4  ;;  %s963_s22 = sshll.u32 (%p76_p3), %s144_s20, 6 }
   0xe   : > { %s149_s25 = scalar_lea.vmem (%p76_p3), %s1569_s2, %s1194_s21  ;;  %s146_s26 = scalar_lea.vmem (%p76_p3), [#allocation2], %s963_s22 }
   0xf   : > { %v192_v0 = vld [vmem:[%s149_s25] sm:$0xff] (%p76_p3)  ;;  %v194_v1 = vld [vmem:[%s149_s25 + $0x8] sm:$0xff] (%p76_p3) }
  0x10   : > { %v196_v2 = vld [vmem:[%s149_s25 + $0x20] sm:$0xff] (%p76_p3)  ;;  %193 = vst [vmem:[%s146_s26] sm:$0xff] (%p76_p3), %v192_v0  ;;  %v198_v3 = vld [vmem:[%s149_s25 + $0x28] sm:$0xff] (%p76_p3) }
  0x11   : > { %195 = vst [vmem:[%s146_s26 + $0x8] sm:$0xff] %v194_v1  ;;  %v200_v4 = vld [vmem:[%s149_s25 + $0x40] sm:$0xff]  ;;  %v202_v5 = vld [vmem:[%s149_s25 + $0x48] sm:$0xff] }
  0x12   : > { %197 = vst [vmem:[%s146_s26 + $0x10] sm:$0xff] %v196_v2  ;;  %v204_v6 = vld [vmem:[%s149_s25 + $0x60] sm:$0xff]  ;;  %v206_v7 = vld [vmem:[%s149_s25 + $0x68] sm:$0xff] }
  0x13   : > { %199 = vst [vmem:[%s146_s26 + $0x18] sm:$0xff] %v198_v3 }
  0x14   : > { %201 = vst [vmem:[%s146_s26 + $0x20] sm:$0xff] %v200_v4 }
  0x15   : > { %203 = vst [vmem:[%s146_s26 + $0x28] sm:$0xff] %v202_v5 }
  0x16   : > { %205 = vst [vmem:[%s146_s26 + $0x30] sm:$0xff] %v204_v6 }
  0x17   : > { %207 = vst [vmem:[%s146_s26 + $0x38] sm:$0xff] %v206_v7 }
  0x18 PF: > { %p966_p5 = scmp.ge.s32.totalorder %s1312_s14, 1  ;;  %p212_p6 = scmp.lt.s32.totalorder %s1312_s14, 3 }
  0x1a   : > { %p213_p7 = pnand %p966_p5, %p212_p6 }
  0x1b   : > { %s968_s29 = sshll.u32 (!%p213_p7), %s1357_s15, 1  ;;  %s219_s11 = sand.u32 (!%p213_p7), 1, %s1304_s12  }
  0x1c   : > { %216 = sbr.rel (%p213_p7) target bundleno = 504 (0x1f8), region = 66  ;;  %p247_p8 = scmp.lt.s32.totalorder (!%p213_p7), %s968_s29, 3 }
  0x1d   : > { %s967_s4 = sshll.u32 (!%p213_p7), %s219_s11, 6  ;;  %s1314_s18 = smov (!%p213_p7), 34  }
  0x1e   : > { %s1499_s11 = scalar_lea.vmem (!%p213_p7), [#allocation2], %s967_s4  ;;  %s1315_s23 = smov (!%p213_p7), 17  }
  0x1f   : > { %p254_p9 = scmp.lt.s32.totalorder (!%p213_p7), %s1357_s15, 1 }
  0x21   : > { %v1208_v8 = vld [vmem:[%s1567_s0 + $0x38] sm:$0xff]  ;;  %v1207_v12 = vld [vmem:[%s1567_s0 + $0x30] sm:$0xff]  ;;  %v1206_v16 = vld [vmem:[%s1567_s0 + $0x28] sm:$0xff]  ;;  %s1575_s29 = smov (!%p247_p8, %s968_s29), 3  ;;  %vm882_vm2 = vcmask 138240   ;;  %s1577_s15 = smov (!%p254_p9, %s1357_s15), 1 }
  0x22   : > { %v1216_v9 = vld [vmem:[%s1567_s0 + $0x78] sm:$0xff]  ;;  %677 = vmatpush.bf16.msra.mxu0 %v1208_v8  ;;  %v1215_v13 = vld [vmem:[%s1567_s0 + $0x70] sm:$0xff]  ;;  %v1214_v17 = vld [vmem:[%s1567_s0 + $0x68] sm:$0xff]  ;;  %s1249_s6 = smul.u32 24, %s1575_s29  ;;  %s256_s12 = scalar_lea.vmem %s1570_s3, %s1577_s15  ;;  %vm892_vm5 = vcmask 131072  }
  0x23   : > { %v1224_v10 = vld [vmem:[%s1567_s0 + $0xb8] sm:$0xff]  ;;  %691 = vmatpush.bf16.msra.mxu1 %v1216_v9  ;;  %v1223_v14 = vld [vmem:[%s1567_s0 + $0xb0] sm:$0xff]  ;;  %v1222_v18 = vld [vmem:[%s1567_s0 + $0xa8] sm:$0xff] }
  0x24   : > { %v1232_v11 = vld [vmem:[%s1567_s0 + $0xf8] sm:$0xff]  ;;  %705 = vmatpush.bf16.msra.mxu2 %v1224_v10  ;;  %v1231_v15 = vld [vmem:[%s1567_s0 + $0xf0] sm:$0xff]  ;;  %v1230_v19 = vld [vmem:[%s1567_s0 + $0xe8] sm:$0xff]  ;;  %s1474_s25 = scalar_lea.vmem %s1568_s1, %s1249_s6 }
  0x25   : > { %719 = vmatpush.bf16.msra.mxu3 %v1232_v11  ;;  %v1205_v20 = vld [vmem:[%s1567_s0 + $0x20] sm:$0xff]  ;;  %v1204_v24 = vld [vmem:[%s1567_s0 + $0x18] sm:$0xff]  ;;  %v1203_v28 = vld [vmem:[%s1567_s0 + $0x10] sm:$0xff] }
  0x26   : > { %678 = vmatpush.bf16.msra.mxu0 %v1207_v12  ;;  %v1213_v21 = vld [vmem:[%s1567_s0 + $0x60] sm:$0xff]  ;;  %v1212_v25 = vld [vmem:[%s1567_s0 + $0x58] sm:$0xff]  ;;  %v1211_v29 = vld [vmem:[%s1567_s0 + $0x50] sm:$0xff] }
  0x27   : > { %692 = vmatpush.bf16.msra.mxu1 %v1215_v13  ;;  %v1221_v22 = vld [vmem:[%s1567_s0 + $0xa0] sm:$0xff]  ;;  %v1220_v26 = vld [vmem:[%s1567_s0 + $0x98] sm:$0xff]  ;;  %v1219_v30 = vld [vmem:[%s1567_s0 + $0x90] sm:$0xff] }
  0x28   : > { %706 = vmatpush.bf16.msra.mxu2 %v1223_v14  ;;  %v1229_v23 = vld [vmem:[%s1567_s0 + $0xe0] sm:$0xff]  ;;  %v1228_v27 = vld [vmem:[%s1567_s0 + $0xd8] sm:$0xff]  ;;  %v1227_v31 = vld [vmem:[%s1567_s0 + $0xd0] sm:$0xff]  ;;  %v1316_v14 = vmov 34  }
  0x29   : > { %720 = vmatpush.bf16.msra.mxu3 %v1231_v15  ;;  %v1202_v32 = vld [vmem:[%s1567_s0 + $0x8] sm:$0xff]  ;;  %v1201_v36 = vld [vmem:[%s1567_s0] sm:$0xff]  ;;  %v1240_v39 = vld [vmem:[%s1567_s0 + $0x138] sm:$0xff]  ;;  %1282 = vset.pattern.permute.xlu0 %v1316_v14  ;;  %v1317_v15 = vmov 17  }
  0x2a   : > { %679 = vmatpush.bf16.msra.mxu0 %v1206_v16  ;;  %v1210_v33 = vld [vmem:[%s1567_s0 + $0x48] sm:$0xff]  ;;  %v1209_v37 = vld [vmem:[%s1567_s0 + $0x40] sm:$0xff]  ;;  %v1198_v41 = vld [vmem:[%s1474_s25 + $0x14] sm:$0xf0]  ;;  %1281 = vset.pattern.permute.xlu2 %v1317_v15 }
  0x2b   : > { %693 = vmatpush.bf16.msra.mxu1 %v1214_v17  ;;  %v1218_v34 = vld [vmem:[%s1567_s0 + $0x88] sm:$0xff]  ;;  %v1217_v38 = vld [vmem:[%s1567_s0 + $0x80] sm:$0xff]  ;;  %v974_v43 = vld [vmem:[%s1474_s25 + $0x18] sm:$0xf0]  ;;  %1283 = vset.pattern.permute.xlu1 %v1316_v14 }
  0x2c   : > { %707 = vmatpush.bf16.msra.mxu2 %v1222_v18  ;;  %v1226_v35 = vld [vmem:[%s1567_s0 + $0xc8] sm:$0xff]  ;;  %v972_v40 = vld [vmem:[%s1474_s25] sm:$0xf]  ;;  %v1195_v42 = vld [vmem:[%s1474_s25 + $0x4] sm:$0xf] }
  0x2d   : > { %721 = vmatpush.bf16.msra.mxu3 %v1230_v19  ;;  %v1248_v44 = vld [vmem:[%s1567_s0 + $0x178] sm:$0xff]  ;;  %v980_v45 = vld [vmem:[%s1474_s25 + $0x8] sm:$0xf]  ;;  %v1199_v46 = vld [vmem:[%s1474_s25 + $0x1c] sm:$0xf0]  ;;  %v973_v50 = vor.u32 %v1198_v41, %v972_v40  ;;  %v977_v51 = vor.u32 %v1195_v42, %v974_v43 }
  0x2e   : > { %680 = vmatpush.bf16.msra.mxu0 %v1205_v20  ;;  %v1225_v47 = vld [vmem:[%s1567_s0 + $0xc0] sm:$0xff]  ;;  %v1196_v48 = vld [vmem:[%s1474_s25 + $0xc] sm:$0xf]  ;;  %v981_v52 = vor.u32 %v1199_v46, %v980_v45  ;;  %v1239_v53 = vld [vmem:[%s1567_s0 + $0x130] sm:$0xff] }
  0x2f   : > { %694 = vmatpush.bf16.msra.mxu1 %v1213_v21  ;;  %v982_v49 = vld [vmem:[%s1474_s25 + $0x20] sm:$0xf0]  ;;  %v1247_v56 = vld [vmem:[%s1567_s0 + $0x170] sm:$0xff]  ;;  %v1238_v58 = vld [vmem:[%s1567_s0 + $0x128] sm:$0xff] }
  0x30   : > { %708 = vmatpush.bf16.msra.mxu2 %v1221_v22  ;;  %v985_v54 = vor.u32 %v1196_v48, %v982_v49  ;;  %v1188_v55 = vld [vmem:[%s1499_s11 + $0x20] sm:$0xff]  ;;  %v1186_v57 = vld [vmem:[%s1499_s11 + $0x10] sm:$0xff]  ;;  %v1246_v59 = vld [vmem:[%s1567_s0 + $0x168] sm:$0xff] }
  0x31   : > { %722 = vmatpush.bf16.msra.mxu3 %v1229_v23  ;;  %783 = vrot.lane.b32.xlu1 %v1188_v55, %s1314_s18  ;;  %v1237_v60 = vld [vmem:[%s1567_s0 + $0x120] sm:$0xff]  ;;  %v1189_v61 = vld [vmem:[%s1499_s11 + $0x28] sm:$0xff]  ;;  %v1187_v63 = vld [vmem:[%s1499_s11 + $0x18] sm:$0xff] }
  0x32   : > { %681 = vmatpush.bf16.msra.mxu0 %v1204_v24  ;;  %770 = vrot.lane.b32.xlu0 %v1186_v57, %s1315_s23  ;;  %v1245_v62 = vld [vmem:[%s1567_s0 + $0x160] sm:$0xff]  ;;  %v1236_v0 = vld [vmem:[%s1567_s0 + $0x118] sm:$0xff]  ;;  %v1235_v2 = vld [vmem:[%s1567_s0 + $0x110] sm:$0xff] }
  0x33   : > { %695 = vmatpush.bf16.msra.mxu1 %v1212_v25  ;;  %v1244_v1 = vld [vmem:[%s1567_s0 + $0x158] sm:$0xff]  ;;  %v1243_v3 = vld [vmem:[%s1567_s0 + $0x150] sm:$0xff]  ;;  %v1234_v4 = vld [vmem:[%s1567_s0 + $0x108] sm:$0xff] }
  0x34   : > { %709 = vmatpush.bf16.msra.mxu2 %v1220_v26  ;;  %v1242_v5 = vld [vmem:[%s1567_s0 + $0x148] sm:$0xff]  ;;  %v1233_v6 = vld [vmem:[%s1567_s0 + $0x100] sm:$0xff]  ;;  %v988_v7 = vld [vmem:[%s1474_s25 + $0x10] sm:$0xf] }
  0x35   : > { %723 = vmatpush.bf16.msra.mxu3 %v1228_v27  ;;  %v1200_v8 = vld [vmem:[%s1474_s25 + $0x24] sm:$0xf0]  ;;  %v1241_v9 = vld [vmem:[%s1567_s0 + $0x140] sm:$0xff]  ;;  %v1197_v10 = vld [vmem:[%s1474_s25 + $0x14] sm:$0xf] }
  0x36   : > { %682 = vmatpush.bf16.msra.mxu0 %v1203_v28  ;;  %v990_v11 = vld [vmem:[%s1474_s25 + $0x28] sm:$0xf0]  ;;  %v989_v12 = vor.u32 %v1200_v8, %v988_v7  ;;  %s1319_s25 = smov 111  }
  0x37   : > { %696 = vmatpush.bf16.msra.mxu1 %v1211_v29  ;;  %v993_v13 = vor.u32 %v1197_v10, %v990_v11  ;;  %v762_v46 = vld [vmem:[%s1499_s11 + $0x8] sm:$0xff] }
  0x38   : > { %710 = vmatpush.bf16.msra.mxu2 %v1219_v30 }
  0x39   : > { %724 = vmatpush.bf16.msra.mxu3 %v1227_v31  ;;  %785 = vrot.lane.b32.xlu1 %v1189_v61, %s1314_s18 }
  0x3a   : > { %683 = vmatpush.bf16.msra.mxu0 %v1202_v32  ;;  %772 = vrot.lane.b32.xlu0 %v1187_v63, %s1315_s23  ;;  %s1320_s23 = smov 94  }
  0x3b   : > { %697 = vmatpush.bf16.msra.mxu1 %v1210_v33 }
  0x3c   : > { %711 = vmatpush.bf16.msra.mxu2 %v1218_v34 }
  0x3d   : > { %725 = vmatpush.bf16.msra.mxu3 %v1226_v35 }
  0x3e   : > { %684 = vmatpush.bf16.msra.mxu0 %v1201_v36 }
  0x3f   : > { %698 = vmatpush.bf16.msra.mxu1 %v1209_v37 }
  0x40   : > { %712 = vmatpush.bf16.msra.mxu2 %v1217_v38 }
  0x41   : > { %726 = vmatpush.bf16.msra.mxu3 %v1225_v47  ;;  %685 = vmatmul.bf16.vlgmr.msra.gmra.mxu0 %v973_v50  ;;  %v761_v47 = vld [vmem:[%s1499_s11] sm:$0xff]  ;;  %v1318_v50 = vmov 0  }
  0x42   : > { %733 = vmatpush.bf16.msrb.mxu0 %v1240_v39  ;;  %699 = vmatmul.bf16.vlgmr.msra.gmra.mxu1 %v977_v51 }
  0x43   : > { %747 = vmatpush.bf16.msrb.mxu1 %v1248_v44  ;;  %713 = vmatmul.bf16.vlgmr.msra.gmra.mxu2 %v981_v52 }
  0x44   : > { %727 = vmatmul.bf16.vlgmr.msra.gmra.mxu3 %v985_v54 }
  0x46   : > { %734 = vmatpush.bf16.msrb.mxu0 %v1239_v53 }
  0x47   : > { %748 = vmatpush.bf16.msrb.mxu1 %v1247_v56 }
  0x4a   : > { %735 = vmatpush.bf16.msrb.mxu0 %v1238_v58 }
  0x4b   : > { %749 = vmatpush.bf16.msrb.mxu1 %v1246_v59 }
  0x4e   : > { %736 = vmatpush.bf16.msrb.mxu0 %v1237_v60 }
  0x4f   : > { %750 = vmatpush.bf16.msrb.mxu1 %v1245_v62 }
  0x52   : > { %737 = vmatpush.bf16.msrb.mxu0 %v1236_v0 }
  0x53   : > { %751 = vmatpush.bf16.msrb.mxu1 %v1244_v1 }
  0x56   : > { %738 = vmatpush.bf16.msrb.mxu0 %v1235_v2 }
  0x57   : > { %752 = vmatpush.bf16.msrb.mxu1 %v1243_v3 }
  0x5a   : > { %739 = vmatpush.bf16.msrb.mxu0 %v1234_v4 }
  0x5b   : > { %753 = vmatpush.bf16.msrb.mxu1 %v1242_v5 }
  0x5e   : > { %740 = vmatpush.bf16.msrb.mxu0 %v1233_v6  ;;  %v1191_v6 = vld [vmem:[%s1499_s11 + $0x38] sm:$0xff] }
  0x5f   : > { %754 = vmatpush.bf16.msrb.mxu1 %v1241_v9 }
  0x61   : > { %741 = vmatmul.bf16.vlgmr.msrb.gmra.mxu0 %v989_v12 }
  0x62   : > { %755 = vmatmul.bf16.vlgmr.msrb.gmra.mxu1 %v993_v13 }
  0xa3   : > { %v784_v26 = vpop.permute.xlu1 %783 }
  0xa4   : > { %v771_v27 = vpop.permute.xlu0 %770 }
  0xab   : > { %v786_v40 = vpop.permute.xlu1 %785 }
  0xac   : > { %v773_v42 = vpop.permute.xlu0 %772 }
  0xbe   : > { %v686_v16 = vpop.f32.mrf.mxu0 }
  0xbf   : > { %v700_v17 = vpop.f32.mrf.mxu1 }
  0xc0   : > { %v701_v19 = vadd.f32 %v700_v17, %v686_v16  ;;  %v1190_v16 = vld [vmem:[%s1499_s11 + $0x30] sm:$0xff] }
  0xc6   : > { %v714_v18 = vpop.f32.mrf.mxu2  ;;  %v688_v20 = vpop.f32.mrf.mxu0 }
  0xc7   : > { %v702_v21 = vpop.f32.mrf.mxu1  ;;  %v728_v22 = vpop.f32.mrf.mxu3  ;;  %v715_v23 = vadd.f32 %v714_v18, %v701_v19 }
  0xc8   : > { %v703_v25 = vadd.f32 %v702_v21, %v688_v20 }
  0xc9   : > { %v729_v24 = vadd.f32 %v728_v22, %v715_v23 }
  0xce   : > { %v716_v28 = vpop.f32.mrf.mxu2 }
  0xcf   : > { %v717_v32 = vadd.f32 %v716_v28, %v703_v25  ;;  %v730_v34 = vpop.f32.mrf.mxu3 }
  0xd1   : > { %v731_v37 = vadd.f32 %v730_v34, %v717_v32 }
  0xde   : > { %v742_v29 = vpop.f32.mrf.mxu0 }
  0xdf   : > { %v743_v30 = vadd.f32 %v742_v29, %v729_v24  ;;  %v756_v31 = vpop.f32.mrf.mxu1 }
  0xe1   : > { %v757_v33 = vadd.f32 %v756_v31, %v743_v30 }
  0xe3   : > { %v789_v35 = vsub.f32 %v757_v33, %v784_v26  ;;  %v776_v36 = vsub.f32 %v757_v33, %v771_v27  ;;  %v763_v49 = vsub.f32 %v757_v33, %v761_v47 }
  0xe5   : > { %817 = vperm.xlu0 %1282, %v789_v35   ;;  %805 = vperm.xlu2 %1281, %v776_v36  }
  0xe6   : > { %v744_v38 = vpop.f32.mrf.mxu0 }
  0xe7   : > { %v745_v39 = vadd.f32 %v744_v38, %v731_v37  ;;  %v758_v41 = vpop.f32.mrf.mxu1 }
  0xe9   : > { %v759_v43 = vadd.f32 %v758_v41, %v745_v39 }
  0xeb   : > { %v790_v44 = vsub.f32 %v759_v43, %v786_v40  ;;  %v777_v45 = vsub.f32 %v759_v43, %v773_v42  ;;  %v764_v48 = vsub.f32 %v759_v43, %v762_v46 }
  0xed   : > { %822 = vperm.xlu1 %1283, %v790_v44   ;;  %810 = vperm.xlu2 %1281, %v777_v45  }
  0xf5   : > { %1285 = vset.pattern.permute.xlu1 %v1318_v50  ;;  %1284 = vset.pattern.permute.xlu2 %v1318_v50 }
  0xf6   : > { %798 = vperm.xlu1 %1285, %v764_v48   ;;  %793 = vperm.xlu2 %1284, %v763_v49  }
 0x13f   : > { %v806_v51 = vpop.permute.xlu2 %805 }
 0x140   : > { %v813_v52 = vsub.f32 %v776_v36, %v806_v51 }
 0x142   : > { %v829_v53 = vmul.f32 %v813_v52, %v813_v52 }
 0x144   : > { %833 = vrot.lane.b32.xlu2 %v829_v53, %s1319_s25 }
 0x147   : > { %v811_v54 = vpop.permute.xlu2 %810 }
 0x148   : > { %v814_v55 = vsub.f32 %v777_v45, %v811_v54 }
 0x14a   : > { %v830_v56 = vmul.f32 %v814_v55, %v814_v55 }
 0x14c   : > { %835 = vrot.lane.b32.xlu0 %v830_v56, %s1319_s25 }
 0x150   : > { %v794_v63 = vpop.permute.xlu2 %793 }
 0x151   : > { %v801_v10 = vsub.f32 %v763_v49, %v794_v63 }
 0x153   : > { %v827_v12 = vmul.f32 %v801_v10, %v801_v10 }
 0x157   : > { %v818_v57 = vpop.permute.xlu0 %817 }
 0x158   : > { %v825_v58 = vsub.f32 %v789_v35, %v818_v57 }
 0x15a   : > { %v841_v59 = vmul.f32 %v825_v58, %v825_v58 }
 0x15c   : > { %845 = vrot.lane.b32.xlu1 %v841_v59, %s1320_s23 }
 0x15f   : > { %v823_v60 = vpop.permute.xlu1 %822 }
 0x160   : > { %v826_v61 = vsub.f32 %v790_v44, %v823_v60 }
 0x162   : > { %v842_v62 = vmul.f32 %v826_v61, %v826_v61 }
 0x164   : > { %847 = vrot.lane.b32.xlu2 %v842_v62, %s1320_s23 }
 0x168   : > { %v799_v0 = vpop.permute.xlu1 %798 }
 0x169   : > { %v802_v2 = vsub.f32 %v764_v48, %v799_v0 }
 0x16b   : > { %v828_v3 = vmul.f32 %v802_v2, %v802_v2 }
 0x19e   : > { %v834_v1 = vpop.permute.xlu2 %833 }
 0x19f   : > { %v839_v14 = vadd.f32 %v834_v1, %v827_v12 }
 0x1be   : > { %v836_v4 = vpop.permute.xlu0 %835  ;;  %v848_v7 = vpop.permute.xlu2 %847 }
 0x1bf   : > { %v840_v5 = vadd.f32 %v836_v4, %v828_v3 }
 0x1c1   : > { %v852_v8 = vadd.f32 %v848_v7, %v840_v5 }
 0x1c3   : > { %v857_v9 = vmul.f32 %v1191_v6, %v852_v8 }
 0x1c5   : > { %1286 = vrsqrt.f32 %v857_v9  ;;  %vm877_vm0 = vcmp.eq.f32.partialorder %v857_v9, inf  ;;  %v880_v31 = vand.u32 2147483648, %v857_v9  ;;  %vm879_vm1 = vcmp.eq.f32.partialorder %v857_v9, 0.0 }
 0x1cb   : > { %v1287_v11 = vpop.eup %1286 }
 0x1cc   : > { %v871_v13 = vmul.f32 %v1287_v11, %v857_v9 }
 0x1ce   : > { %v872_v15 = vmul.f32 %v1287_v11, %v871_v13  ;;  %v846_v17 = vpop.permute.xlu1 %845 }
 0x1cf   : > { %v851_v18 = vadd.f32 %v846_v17, %v839_v14 }
 0x1d0   : > { %v873_v20 = vmul.f32 0.5, %v872_v15 }
 0x1d1   : > { %v856_v19 = vmul.f32 %v1190_v16, %v851_v18 }
 0x1d2   : > { %v874_v21 = vsub.f32 1.5, %v873_v20 }
 0x1d3   : > { %1288 = vrsqrt.f32 %v856_v19  ;;  %vm865_vm3 = vcmp.eq.f32.partialorder %v856_v19, inf  ;;  %v868_v34 = vand.u32 2147483648, %v856_v19  ;;  %vm867_vm4 = vcmp.eq.f32.partialorder %v856_v19, 0.0 }
 0x1d4   : > { %v875_v23 = vmul.f32 %v1287_v11, %v874_v21 }
 0x1d6   : > { %v876_v26 = vmul.f32 %v875_v23, %v857_v9 }
 0x1d8   : > { %v878_v29 = vsel %vm877_vm0, %v857_v9, %v876_v26 }
 0x1d9   : > { %v1289_v22 = vpop.eup %1288  ;;  %v881_v33 = vsel %vm879_vm1, %v880_v31, %v878_v29 }
 0x1da   : > { %v859_v24 = vmul.f32 %v1289_v22, %v856_v19  ;;  %v884_v37 = vsel %vm882_vm2, %v881_v33, 0.0 }
 0x1dc   : > { %v860_v25 = vmul.f32 %v1289_v22, %v859_v24 }
 0x1de   : > { %v861_v27 = vmul.f32 0.5, %v860_v25 }
 0x1e0   : > { %v862_v28 = vsub.f32 1.5, %v861_v27 }
 0x1e2   : > { %v863_v30 = vmul.f32 %v1289_v22, %v862_v28 }
 0x1e4   : > { %v864_v32 = vmul.f32 %v863_v30, %v856_v19 }
 0x1e6   : > { %v866_v35 = vsel %vm865_vm3, %v856_v19, %v864_v32 }
 0x1e7   : > { %v869_v36 = vsel %vm867_vm4, %v868_v34, %v866_v35 }
 0x1e8   : > { %v883_v38 = vsel %vm882_vm2, %v869_v36, 0.0 }
 0x1e9   : > { %v885_v39 = vadd.f32 %v884_v37, %v883_v38 }
 0x1eb   : > { %v886_v40 = vrot.slane %v885_v39, 4 }
 0x1ed   : > { %v887_v41 = vadd.f32 %v886_v40, %v885_v39 }
 0x1ef   : > { %v888_v42 = vrot.slane %v887_v41, 2 }
 0x1f1   : > { %v889_v43 = vadd.f32 %v888_v42, %v887_v41 }
 0x1f3   : > { %v890_v44 = vrot.slane %v889_v43, 1 }
 0x1f5   : > { %v891_v45 = vadd.f32 %v890_v44, %v889_v43 }
 0x1f7   : > { %893 = vst.msk [vmem:[%s256_s12] sm:$0x1] %vm892_vm5, %v891_v45 }
 0x1f8 PF: > { %p10_p10 = scmp.ge.s32.totalorder %s1360_s16, 4   ;;  %s1571_s12 = smov %s1308_s13 }
 0x1f9   : > { %s1572_s13 = smov %s1369_s19  ;;  %s1573_s14 = smov %s1360_s16 }
 0x1fa   :  { %12 = sbr.rel (!%p10_p10) target bundleno = 2 (0x2), region = 111 }

</bundles_post_ra>
